<compile_context>
chip_gen: v7x
topology: tpu7x:2x2x1
jax: 0.10.0
libtpu: 0.0.40
codegen_flags: <defaults>
</compile_context>

<pallas_src>
import jax
import jax.numpy as jnp
from jax.experimental import pallas as pl
from jax.experimental.pallas import tpu as pltpu


LANES = 512              # lane-dense slab width (multiple of 128)
SLAB_ALIGN = 8 * LANES   # 4096: keeps the slab's sublane dim a multiple of 8
MAX_BLOCK_ROWS = 2048    # 4 MiB f32 tile -> 16 MiB double-buffered in+out footprint
MIN_BLOCK_ROWS = 256     # 512 KiB tile floor so the ~0.35 us/step overhead stays small
TARGET_GRID_STEPS = 8    # enough steps for DMA/compute overlap + megacore sharding


def _round_up(x, m):
    return ((x + m - 1) // m) * m


def _affine_kernel(a_ref, c_ref, x_ref, o_ref):
    # a_ref, c_ref: (1, 1) folded scalars in SMEM.
    # x_ref, o_ref: (blk, LANES) VMEM tiles (partial edge blocks masked by Pallas).
    a = a_ref[0, 0]
    c = c_ref[0, 0]
    # Compute in f32 and cast only at the store (v5e has no bf16 VPU).
    o_ref[...] = (x_ref[...].astype(jnp.float32) * a + c).astype(o_ref.dtype)


def my_module_forward(x, w1, b1, w2, b2):
    """Forward of Linear(1,2) -> Linear(2,1) on x of shape (N, 1).

    PyTorch parameter layouts: w1 (2,1), b1 (2,), w2 (1,2), b2 (1,).

    VMEM budget: the largest tile is 2048x512 f32 = 4 MiB, so the
    double-buffered in+out footprint is 16 MiB.  The scoped-VMEM default is
    16 MiB on v5e and 32 MiB on v6e/v7x, so the limit is raised explicitly to
    48 MiB (every generation has >= 64 MiB of physical VMEM).
    """
    n = x.shape[0]
    dtype = x.dtype

    # Fold the two linears into one scalar affine map (exact in f32; glue code).
    a = (w2 @ w1).reshape(1, 1).astype(jnp.float32)
    c = (w2 @ b1.reshape(2, 1) + b2.reshape(1, 1)).reshape(1, 1).astype(jnp.float32)

    xf = x.reshape(-1)

    # Largest prefix that forms a fully (8, 128)-aligned (rows, LANES) slab.
    prefix = (n // SLAB_ALIGN) * SLAB_ALIGN
    if prefix == 0:
        # Tiny input (< 4096 elements): one fused jnp multiply-add is already
        # optimal; a kernel launch would be pure overhead.
        y = xf.astype(jnp.float32) * a[0, 0] + c[0, 0]
        return y.astype(dtype).reshape(n, 1)

    rows = prefix // LANES                        # multiple of 8

    # Tile size: aim for >= TARGET_GRID_STEPS grid steps (pipelining + both
    # v7x TensorCores), but never below a 512 KiB tile (per-step overhead)
    # nor above a 4 MiB tile (VMEM / diminishing returns).
    blk = _round_up(pl.cdiv(rows, TARGET_GRID_STEPS), 8)
    blk = max(blk, MIN_BLOCK_ROWS)
    blk = min(blk, MAX_BLOCK_ROWS, rows)
    grid = (pl.cdiv(rows, blk),)                  # partial edge block is legal/masked

    # Zero-copy view when N is aligned; otherwise slice only the aligned prefix
    # (no full-array pad pass around the kernel).
    x2 = (xf if prefix == n else xf[:prefix]).reshape(rows, LANES)

    out2 = pl.pallas_call(
        _affine_kernel,
        out_shape=jax.ShapeDtypeStruct((rows, LANES), dtype),
        grid=grid,
        in_specs=[
            pl.BlockSpec(memory_space=pltpu.MemorySpace.SMEM),   # a (folded weight)
            pl.BlockSpec(memory_space=pltpu.MemorySpace.SMEM),   # c (folded bias)
            pl.BlockSpec((blk, LANES), lambda i: (i, 0)),        # x row tiles
        ],
        out_specs=pl.BlockSpec((blk, LANES), lambda i: (i, 0)),
        compiler_params=pltpu.CompilerParams(
            dimension_semantics=("parallel",),     # shard row tiles across TCs
            vmem_limit_bytes=48 << 20,             # 16 MiB footprint + headroom
        ),
        cost_estimate=pl.CostEstimate(
            flops=2 * prefix,
            transcendentals=0,
            bytes_accessed=2 * prefix * dtype.itemsize),
    )(a, c, x2)

    if prefix == n:
        return out2.reshape(n, 1)                  # provably copy-free fast path

    # Ragged tail (< 4096 elements): tiny jnp fma, then one concat to assemble.
    tail = (xf[prefix:].astype(jnp.float32) * a[0, 0] + c[0, 0]).astype(dtype)
    return jnp.concatenate([out2.reshape(-1), tail]).reshape(n, 1)


if __name__ == "__main__":
    key = jax.random.PRNGKey(0)
    kx1, kx2, kx3, k1, k2, k3, k4 = jax.random.split(key, 7)

    # Deterministic parameters in PyTorch layouts: Linear(1,2) then Linear(2,1).
    w1 = jax.random.uniform(k1, (2, 1), jnp.float32, -1.0, 1.0)   # layer1.weight
    b1 = jax.random.uniform(k2, (2,), jnp.float32, -1.0, 1.0)     # layer1.bias
    w2 = jax.random.uniform(k3, (1, 2), jnp.float32, -0.7, 0.7)   # layer2.weight
    b2 = jax.random.uniform(k4, (1,), jnp.float32, -0.7, 0.7)     # layer2.bias

    def ref_forward(xv):
        return (xv @ w1.T + b1) @ w2.T + b2

    # Case 1: aligned N -> copy-free kernel path (single grid step).
    x_a = jax.random.normal(kx1, (4096, 1), jnp.float32)
    y_a = jax.block_until_ready(my_module_forward(x_a, w1, b1, w2, b2))
    assert y_a.shape == (4096, 1)
    assert jnp.allclose(y_a, ref_forward(x_a), atol=1e-5, rtol=1e-5)

    # Case 2: ragged N -> multi-step grid, partial edge block, tiny jnp tail.
    x_b = jax.random.normal(kx2, (300000, 1), jnp.float32)
    y_b = jax.block_until_ready(my_module_forward(x_b, w1, b1, w2, b2))
    assert y_b.shape == (300000, 1)
    assert jnp.allclose(y_b, ref_forward(x_b), atol=1e-5, rtol=1e-5)

    # Case 3: tiny N -> pure-jnp fallback (no kernel launch needed).
    x_c = jax.random.normal(kx3, (1000, 1), jnp.float32)
    y_c = jax.block_until_ready(my_module_forward(x_c, w1, b1, w2, b2))
    assert y_c.shape == (1000, 1)
    assert jnp.allclose(y_c, ref_forward(x_c), atol=1e-5, rtol=1e-5)

    print("KERNEL_OK")
</pallas_src>

<mosaic_0001>
module attributes {stable_mosaic.version = 11 : i64} {
  func.func @_affine_kernel(%arg0: i32, %arg1: memref<1x1xf32, #tpu.memory_space<smem>>, %arg2: memref<1x1xf32, #tpu.memory_space<smem>>, %arg3: memref<8x512xf32, #tpu.memory_space<vmem>>, %arg4: memref<8x512xf32, #tpu.memory_space<vmem>>) attributes {dimension_semantics = [#tpu.dimension_semantics<parallel>], iteration_bounds = array<i64: 1>, scalar_prefetch = 0 : i64, scratch_operands = 0 : i64, tpu.core_type = #tpu.core_type<tc>, window_params = [{transform_indices = @transform_0, window_bounds = array<i64: 1, 1>}, {transform_indices = @transform_1, window_bounds = array<i64: 1, 1>}, {transform_indices = @transform_2, window_bounds = array<i64: 8, 512>}, {transform_indices = @transform_3, window_bounds = array<i64: 8, 512>}]} {
    %c0 = arith.constant 0 : index
    %c0_0 = arith.constant 0 : index
    %0 = memref.load %arg1[%c0, %c0_0] : memref<1x1xf32, #tpu.memory_space<smem>>
    %c0_1 = arith.constant 0 : index
    %c0_2 = arith.constant 0 : index
    %1 = memref.load %arg2[%c0_1, %c0_2] : memref<1x1xf32, #tpu.memory_space<smem>>
    %c0_3 = arith.constant 0 : index
    %c0_4 = arith.constant 0 : index
    %2 = vector.load %arg3[%c0_3, %c0_4] : memref<8x512xf32, #tpu.memory_space<vmem>>, vector<8x512xf32>
    %3 = vector.broadcast %0 : f32 to vector<8x512xf32>
    %4 = arith.mulf %2, %3 : vector<8x512xf32>
    %5 = vector.broadcast %1 : f32 to vector<8x512xf32>
    %6 = arith.addf %4, %5 : vector<8x512xf32>
    %c0_5 = arith.constant 0 : index
    %c0_6 = arith.constant 0 : index
    %7 = vector.load %arg4[%c0_5, %c0_6] : memref<8x512xf32, #tpu.memory_space<vmem>>, vector<8x512xf32>
    tpu.vector_store %arg4[%c0_5, %c0_6], %6 {strides = array<i32>} : memref<8x512xf32, #tpu.memory_space<vmem>>, vector<8x512xf32>,
    return
  }
  func.func @transform_0(%arg0: i32) -> (i32, i32) {
    %c0_i32 = arith.constant 0 : i32
    %c0_i32_0 = arith.constant 0 : i32
    %c0_i32_1 = arith.constant 0 : i32
    return %c0_i32, %c0_i32_0 : i32, i32
  }
  func.func @transform_1(%arg0: i32) -> (i32, i32) {
    %c0_i32 = arith.constant 0 : i32
    %c0_i32_0 = arith.constant 0 : i32
    %c0_i32_1 = arith.constant 0 : i32
    return %c0_i32, %c0_i32_0 : i32, i32
  }
  func.func @transform_2(%arg0: i32) -> (i32, i32) {
    %c0_i32 = arith.constant 0 : i32
    %c0_i32_0 = arith.constant 0 : i32
    return %arg0, %c0_i32 : i32, i32
  }
  func.func @transform_3(%arg0: i32) -> (i32, i32) {
    %c0_i32 = arith.constant 0 : i32
    %c0_i32_0 = arith.constant 0 : i32
    return %arg0, %c0_i32 : i32, i32
  }
}

</mosaic_0001>

<bundles_post_ra>
// kernel: tpu_custom_call.1
= control target key start
LH: loop header
LB: loop body
LE: loop exit
PB: predicated region body
PF: predicated region fallthrough
CT: control target
= control target key end

     0   :  { %10 = vsyncpa [#allocation5], 0  ;;  %s166_s0 = inlined_call_operand.<no memory space> [shape: f32[1,1], index: 0, kind: input, shape index: {}]   ;;  %s167_s1 = inlined_call_operand.<no memory space> [shape: f32[1,1], index: 1, kind: input, shape index: {}]   ;;  %s168_s2 = inlined_call_operand.hbm [shape: f32[8,512], index: 2, kind: input, shape index: {}]   ;;  %s169_s3 = inlined_call_operand.hbm [shape: f32[8,512], index: 3, kind: output, shape index: {}]  }
   0x1   :  { %11 = vsyncpa [#allocation6], 0  ;;  %s114_s12 = smov [#allocation4]   ;;  %s66_s16 = scalar_lea.hbm %s168_s2, 512 }
   0x2   :  { %s22_s13 = sshll.u32 %s114_s12, 4  ;;  %p67_p0 = scmp.ne.s32.totalorder %s168_s2, %s66_s16  ;;  %s23_s13 = int_to_ptr.vmem [resolvable:$true] %s22_s13 }
   0x3   :  { %p70_p1 = scmp.lt.u32.totalorder %s66_s16, %s168_s2 }
   0x5   :  { %p72_p2 = pnand %p70_p1, %p67_p0 }
   0x7   :  { %75 = shalt.err (!%p72_p2)
}
   0x8   :  { %s76_s21 = scalar_lea.vmem %s23_s13, 512  ;;  %p81_p4 = scmp.lt.s32.totalorder %s23_s13, %s23_s13 }
   0x9   :  { %p77_p3 = scmp.ne.s32.totalorder %s23_s13, %s76_s21  ;;  %p82_p5 = scmp.lt.s32.totalorder %s76_s21, %s76_s21 }
   0xb   :  { %p83_p6 = por %p82_p5, %p81_p4 }
   0xd   :  { %p84_p7 = pnand %p83_p6, %p77_p3 }
   0xf   :  { %87 = shalt.err (!%p84_p7)
}
  0x10   :  { %25 = dma.hbm_to_vmem [thread:$0]  %s168_s2, 512, %s23_s13, [#allocation5]  }
  0x11   :  { %110 = dma.done.wait [#allocation5], 512  }
  0x12   :  { %111 = vsyncadd [#allocation5], 4294966784  ;;  %v35_v0 = vstv %s166_s0  ;;  %v31_v1 = vld [vmem:[#allocation4] sm:$0xff]  ;;  %v40_v2 = vstv %s167_s1  ;;  %v32_v3 = vld [vmem:[#allocation4 + $0x8] sm:$0xff]  ;;  %s115_s28 = smov [#allocation7]  }
  0x13   :  { %v33_v4 = vld [vmem:[#allocation4 + $0x10] sm:$0xff]  ;;  %v36_v5 = vmul.f32 %v35_v0, %v31_v1  ;;  %v37_v6 = vmul.f32 %v35_v0, %v32_v3  ;;  %v34_v8 = vld [vmem:[#allocation4 + $0x18] sm:$0xff]  ;;  %s55_s29 = sshll.u32 %s115_s28, 4  ;;  %s56_s29 = int_to_ptr.vmem [resolvable:$true] %s55_s29 }
  0x14   :  { %v38_v7 = vmul.f32 %v35_v0, %v33_v4  ;;  %v39_v9 = vmul.f32 %v35_v0, %v34_v8  ;;  %s88_s0 = scalar_lea.vmem %s56_s29, 512  ;;  %p93_p9 = scmp.lt.s32.totalorder %s56_s29, %s56_s29 }
  0x15   :  { %v41_v10 = vadd.f32 %v40_v2, %v36_v5  ;;  %v42_v11 = vadd.f32 %v40_v2, %v37_v6  ;;  %p89_p8 = scmp.ne.s32.totalorder %s56_s29, %s88_s0  ;;  %p94_p10 = scmp.lt.s32.totalorder %s88_s0, %s88_s0 }
  0x16   :  { %v43_v12 = vadd.f32 %v40_v2, %v38_v7  ;;  %v44_v13 = vadd.f32 %v40_v2, %v39_v9 }
  0x17   :  { %45 = vst [vmem:[#allocation7] sm:$0xff] %v41_v10  ;;  %46 = vst [vmem:[#allocation7 + $0x8] sm:$0xff] %v42_v11  ;;  %p95_p11 = por %p94_p10, %p93_p9 }
  0x18   :  { %47 = vst [vmem:[#allocation7 + $0x10] sm:$0xff] %v43_v12  ;;  %48 = vst [vmem:[#allocation7 + $0x18] sm:$0xff] %v44_v13 }
  0x19   :  { %p96_p12 = pnand %p95_p11, %p89_p8 }
  0x1b   :  { %99 = shalt.err (!%p96_p12)
}
  0x1c   :  { %s100_s30 = scalar_lea.hbm %s169_s3, 512 }
  0x1d   :  { %p101_p13 = scmp.ne.s32.totalorder %s169_s3, %s100_s30  ;;  %p104_p0 = scmp.lt.u32.totalorder %s100_s30, %s169_s3 }
  0x1f   :  { %p106_p1 = pnand %p104_p0, %p101_p13 }
  0x21   :  { %109 = shalt.err (!%p106_p1)
}
  0x22   :  { %58 = dma.vmem_to_hbm [thread:$0]  %s56_s29, 512, %s169_s3, [#allocation6]  }
  0x23   :  { %112 = dma.done.wait [#allocation6], 512  }
  0x24   :  { %113 = vsyncadd [#allocation6], 4294966784 }
  0x25   :  { %62 = vsyncpa [#allocation5], 1 }
  0x26   :  { %63 = vsyncpa [#allocation6], 1 }

</bundles_post_ra>
